<compile_context>
chip_gen: v6e
topology: v6e:2x2x1
jax: 0.10.0
libtpu: 0.0.40
codegen_flags: <defaults>
</compile_context>

<pallas_src>
import functools
import math

import jax
import jax.numpy as jnp
from jax.experimental import pallas as pl
from jax.experimental.pallas import tpu as pltpu

BN_EPS = 1e-5
LANE = 128        # lane width: feature dims padded to multiples of this
SUBLANE = 8       # sublane width: batch padded to multiples of this

# Fused path must fit comfortably inside the smallest physical VMEM (v7x 64 MiB).
_FUSED_VMEM_GATE_BYTES = 40 * 1024 * 1024


def _round_up(x, m):
    return (x + m - 1) // m * m


def _full_spec(shape):
    # Whole-array block, no grid.
    n = len(shape)
    return pl.BlockSpec(shape, lambda: (0,) * n)


def _make_fused_mlp_kernel(num_hidden, b_real, b_pad):
    """Fused kernel: Linear -> [ReLU -> BN(train) -> Linear] * num_hidden.

    Ref order: x_ref, w0, b0, (gamma_i, beta_i, w_i, b_i)*num_hidden, o_ref.
    All feature dims are lane-padded; padded lanes of W/b/gamma/beta are zero,
    so padded lanes stay exactly zero through every stage (0 * rsqrt(eps) = 0).
    Padded batch rows carry garbage but are masked out of the BN statistics
    and sliced off by the wrapper.
    """
    need_row_mask = b_pad != b_real
    inv_b = 1.0 / float(b_real)

    def kernel(*refs):
        x_ref = refs[0]
        o_ref = refs[-1]
        p_refs = refs[1:-1]

        # ---- first Linear: h = x @ W0 + b0 (stored-dtype MXU inputs, f32 acc)
        w0_ref, b0_ref = p_refs[0], p_refs[1]
        h = (
            jnp.dot(x_ref[...], w0_ref[...], preferred_element_type=jnp.float32)
            + b0_ref[...]
        )

        if need_row_mask:
            # (8, b_pad) mask slab: row 0 holds the real-row mask, rows 1..7
            # are zero.  Masked column sums are done on the MXU (it has slack
            # here) so no full-size [B_pad, F] masked temporaries are built.
            row_iota = jax.lax.broadcasted_iota(jnp.int32, (SUBLANE, b_pad), 0)
            col_iota = jax.lax.broadcasted_iota(jnp.int32, (SUBLANE, b_pad), 1)
            mask8 = jnp.where(
                (row_iota == 0) & (col_iota < b_real), 1.0, 0.0
            ).astype(jnp.float32)

            def col_sum(v):  # masked sum over the batch axis -> [1, F]
                return jnp.dot(mask8, v, preferred_element_type=jnp.float32)[0:1, :]
        else:

            def col_sum(v):
                return jnp.sum(v, axis=0, keepdims=True)

        # ---- hidden stages: ReLU -> BatchNorm1d (batch stats, f32) -> Linear
        for i in range(num_hidden):
            g_ref, be_ref, w_ref, b_ref = p_refs[2 + 4 * i: 6 + 4 * i]
            a = jnp.maximum(h, 0.0)                        # ReLU (VPU)
            mean = col_sum(a) * inv_b                      # [1, F]
            ac = a - mean                                  # reused for var & norm
            var = col_sum(ac * ac) * inv_b                 # [1, F]
            # Fold rsqrt(var+eps)*gamma at [1, F] before the broadcast multiply.
            scale = jax.lax.rsqrt(var + BN_EPS) * g_ref[...]
            hn = ac * scale + be_ref[...]
            h = (
                jnp.dot(
                    hn.astype(w_ref.dtype),
                    w_ref[...],
                    preferred_element_type=jnp.float32,
                )
                + b_ref[...]
            )

        o_ref[...] = h

    return kernel


def _fused_vmem_bytes(x_pad, flat_params, b_pad, d_out_pad):
    """Rough VMEM budget for the fully-resident fused path."""
    io_bytes = int(x_pad.size) * x_pad.dtype.itemsize
    io_bytes += sum(int(a.size) * a.dtype.itemsize for a in flat_params)
    io_bytes += b_pad * d_out_pad * 4  # f32 output
    max_feat = max([x_pad.shape[1]] + [a.shape[-1] for a in flat_params])
    # live f32 activation temporaries (h, relu, centered, squared, normalized) + slack
    act_bytes = 6 * b_pad * max_feat * 4
    return io_bytes + act_bytes


def _fused_mlp_call(x_pad, flat_params, b_real):
    b_pad, _ = x_pad.shape
    num_hidden = (len(flat_params) - 2) // 4
    d_out_pad = flat_params[-1].shape[1]

    needed = _fused_vmem_bytes(x_pad, flat_params, b_pad, d_out_pad)
    if needed > _FUSED_VMEM_GATE_BYTES:
        # TODO(synk): stream weights per layer from HBM (memory_space=pl.ANY +
        # manual double-buffered pltpu.make_async_copy) instead of raising.
        raise NotImplementedError(
            f"fused MLP needs ~{needed >> 20} MiB VMEM "
            f"(> {_FUSED_VMEM_GATE_BYTES >> 20} MiB gate); "
            "use smaller layers or bf16/int8 weights, or add weight streaming."
        )
    vmem_limit = int(min(max(2 * needed, 32 * 1024 * 1024), 56 * 1024 * 1024))

    kernel = _make_fused_mlp_kernel(num_hidden, b_real, b_pad)

    # Advisory cost estimate: 2*B*K*N flops per linear, one rsqrt per BN feature.
    flops = 2 * b_pad * flat_params[0].shape[0] * flat_params[0].shape[1]
    transcendentals = 0
    for i in range(num_hidden):
        w = flat_params[2 + 4 * i + 2]
        flops += 2 * b_pad * w.shape[0] * w.shape[1]
        transcendentals += w.shape[0]
    bytes_accessed = (
        int(x_pad.size) * x_pad.dtype.itemsize
        + sum(int(a.size) * a.dtype.itemsize for a in flat_params)
        + b_pad * d_out_pad * 4
    )

    return pl.pallas_call(
        kernel,
        out_shape=jax.ShapeDtypeStruct((b_pad, d_out_pad), jnp.float32),
        in_specs=[_full_spec(a.shape) for a in (x_pad, *flat_params)],
        out_specs=_full_spec((b_pad, d_out_pad)),
        compiler_params=pltpu.CompilerParams(vmem_limit_bytes=vmem_limit),
        cost_estimate=pl.CostEstimate(
            flops=flops,
            transcendentals=transcendentals,
            bytes_accessed=bytes_accessed,
        ),
    )(x_pad, *flat_params)


def init_mlp_params(key, n_inputs, n_hidden, n_classes, weight_dtype=jnp.bfloat16):
    """Init mimicking nn.Linear defaults (uniform +-1/sqrt(fan_in)) on the REAL
    shapes, then zero-padded to lane multiples (128).  Weight matrices are
    stored in `weight_dtype` (bf16 by default: halves weight DMA / VMEM);
    biases / gamma / beta stay f32 (tiny, added after the f32 accumulate).
    BatchNorm1d affine: gamma=1, beta=0 on real features, 0 on padded lanes."""
    layer_dim = [n_inputs, *n_hidden, n_classes]
    params = []
    for i in range(len(layer_dim) - 1):
        fan_in, fan_out = layer_dim[i], layer_dim[i + 1]
        fin_p, fout_p = _round_up(fan_in, LANE), _round_up(fan_out, LANE)
        key, kw, kb = jax.random.split(key, 3)
        bound = 1.0 / math.sqrt(fan_in)
        w = jax.random.uniform(kw, (fan_in, fan_out), jnp.float32, -bound, bound)
        b = jax.random.uniform(kb, (1, fan_out), jnp.float32, -bound, bound)
        w_p = (
            jnp.zeros((fin_p, fout_p), jnp.float32)
            .at[:fan_in, :fan_out]
            .set(w)
            .astype(weight_dtype)
        )
        b_p = jnp.zeros((1, fout_p), jnp.float32).at[:, :fan_out].set(b)
        if i == 0:
            params.append({"w": w_p, "b": b_p})
        else:
            gamma = jnp.zeros((1, fin_p), jnp.float32).at[:, :fan_in].set(1.0)
            beta = jnp.zeros((1, fin_p), jnp.float32)
            params.append({"gamma": gamma, "beta": beta, "w": w_p, "b": b_p})
    return params


@functools.partial(jax.jit, static_argnums=(2,))
def mlp_forward(x, params, n_classes):
    B, d_in = x.shape
    w0 = params[0]["w"]
    d_in_pad = w0.shape[0]
    b_pad = _round_up(max(B, SUBLANE), SUBLANE)

    # Lane/sublane-pad the input once in the wrapper (layout plumbing), stored
    # in the same dtype as the weights so the first dot needs no in-kernel cast.
    x_pad = (
        jnp.zeros((b_pad, d_in_pad), w0.dtype).at[:B, :d_in].set(x.astype(w0.dtype))
    )

    flat = [params[0]["w"], params[0]["b"]]
    for p in params[1:]:
        flat += [p["gamma"], p["beta"], p["w"], p["b"]]

    out_pad = _fused_mlp_call(x_pad, flat, B)
    return out_pad[:B, :n_classes]


def _reference_forward(x, params, n_classes):
    """Pure-JAX reference on the padded params (f32 math) for a sanity check."""
    h = x.astype(jnp.float32) @ params[0]["w"][: x.shape[1]].astype(jnp.float32)
    h = h + params[0]["b"][:, : h.shape[1]]
    for p in params[1:]:
        a = jnp.maximum(h, 0.0)
        mean = jnp.mean(a, axis=0, keepdims=True)
        var = jnp.mean((a - mean) ** 2, axis=0, keepdims=True)
        hn = (a - mean) * jax.lax.rsqrt(var + BN_EPS) * p["gamma"] + p["beta"]
        h = hn @ p["w"].astype(jnp.float32) + p["b"]
    return h[:, :n_classes]


if __name__ == "__main__":
    # Small deterministic config consistent with MLP.forward:
    # x: [batch, n_inputs], n_hidden list of ints, output: [batch, n_classes]
    batch, n_inputs, n_hidden, n_classes = 8, 32, [64, 32], 10

    key = jax.random.PRNGKey(0)
    key, kx = jax.random.split(key)
    x = jax.random.normal(kx, (batch, n_inputs), jnp.float32)

    params = init_mlp_params(key, n_inputs, n_hidden, n_classes)

    out = mlp_forward(x, params, n_classes)
    out = jax.block_until_ready(out)

    assert out.shape == (batch, n_classes), out.shape
    assert out.dtype == jnp.float32
    assert bool(jnp.all(jnp.isfinite(out)))

    # Loose tolerance: bf16 MXU inputs vs f32 reference.
    ref = _reference_forward(x, params, n_classes)
    max_err = float(jnp.max(jnp.abs(out - ref)))
    assert max_err < 7.5e-2, f"max abs err vs f32 reference: {max_err}"

    print("KERNEL_OK")
</pallas_src>

<mosaic_0001>
module attributes {stable_mosaic.version = 11 : i64} {
  func.func @kernel(%arg0: memref<8x128xbf16, #tpu.memory_space<vmem>>, %arg1: memref<128x128xbf16, #tpu.memory_space<vmem>>, %arg2: memref<1x128xf32, #tpu.memory_space<vmem>>, %arg3: memref<1x128xf32, #tpu.memory_space<vmem>>, %arg4: memref<1x128xf32, #tpu.memory_space<vmem>>, %arg5: memref<128x128xbf16, #tpu.memory_space<vmem>>, %arg6: memref<1x128xf32, #tpu.memory_space<vmem>>, %arg7: memref<1x128xf32, #tpu.memory_space<vmem>>, %arg8: memref<1x128xf32, #tpu.memory_space<vmem>>, %arg9: memref<128x128xbf16, #tpu.memory_space<vmem>>, %arg10: memref<1x128xf32, #tpu.memory_space<vmem>>, %arg11: memref<8x128xf32, #tpu.memory_space<vmem>>) attributes {dimension_semantics = [], scalar_prefetch = 0 : i64, scratch_operands = 0 : i64, tpu.core_type = #tpu.core_type<tc>} {
    %c0 = arith.constant 0 : index
    %c0_0 = arith.constant 0 : index
    %0 = vector.load %arg0[%c0, %c0_0] : memref<8x128xbf16, #tpu.memory_space<vmem>>, vector<8x128xbf16>
    %c0_1 = arith.constant 0 : index
    %c0_2 = arith.constant 0 : index
    %1 = vector.load %arg1[%c0_1, %c0_2] : memref<128x128xbf16, #tpu.memory_space<vmem>>, vector<128x128xbf16>
    %cst = arith.constant dense<0.000000e+00> : vector<8x128xf32>
    %2 = tpu.matmul %0, %1, %cst {dimension_numbers = #tpu.dot_dimension_numbers<[1], [0], [0], [1], [0, 0, 1, 1], [], []>} : vector<8x128xbf16>, vector<128x128xbf16>, vector<8x128xf32> -> vector<8x128xf32>
    %c0_3 = arith.constant 0 : index
    %c0_4 = arith.constant 0 : index
    %3 = vector.load %arg2[%c0_3, %c0_4] : memref<1x128xf32, #tpu.memory_space<vmem>>, vector<1x128xf32>
    %4 = vector.broadcast %3 : vector<1x128xf32> to vector<8x128xf32>
    %5 = arith.addf %2, %4 : vector<8x128xf32>
    %cst_5 = arith.constant 0.000000e+00 : f32
    %6 = vector.broadcast %cst_5 : f32 to vector<8x128xf32>
    %7 = arith.maximumf %5, %6 : vector<8x128xf32>
    %cst_6 = arith.constant dense<0.000000e+00> : vector<128xf32>
    %8 = vector.multi_reduction <add>, %7, %cst_6 [0] : vector<8x128xf32> to vector<128xf32>
    %9 = vector.shape_cast %8 : vector<128xf32> to vector<1x128xf32>
    %cst_7 = arith.constant 1.250000e-01 : f32
    %10 = vector.broadcast %cst_7 : f32 to vector<1x128xf32>
    %11 = arith.mulf %9, %10 : vector<1x128xf32>
    %12 = vector.broadcast %11 : vector<1x128xf32> to vector<8x128xf32>
    %13 = arith.subf %7, %12 : vector<8x128xf32>
    %14 = arith.mulf %13, %13 : vector<8x128xf32>
    %cst_8 = arith.constant dense<0.000000e+00> : vector<128xf32>
    %15 = vector.multi_reduction <add>, %14, %cst_8 [0] : vector<8x128xf32> to vector<128xf32>
    %16 = vector.shape_cast %15 : vector<128xf32> to vector<1x128xf32>
    %cst_9 = arith.constant 1.250000e-01 : f32
    %17 = vector.broadcast %cst_9 : f32 to vector<1x128xf32>
    %18 = arith.mulf %16, %17 : vector<1x128xf32>
    %cst_10 = arith.constant 9.99999974E-6 : f32
    %19 = vector.broadcast %cst_10 : f32 to vector<1x128xf32>
    %20 = arith.addf %18, %19 : vector<1x128xf32>
    %21 = math.rsqrt %20 : vector<1x128xf32>
    %c0_11 = arith.constant 0 : index
    %c0_12 = arith.constant 0 : index
    %22 = vector.load %arg3[%c0_11, %c0_12] : memref<1x128xf32, #tpu.memory_space<vmem>>, vector<1x128xf32>
    %23 = arith.mulf %21, %22 : vector<1x128xf32>
    %24 = vector.broadcast %23 : vector<1x128xf32> to vector<8x128xf32>
    %25 = arith.mulf %13, %24 : vector<8x128xf32>
    %c0_13 = arith.constant 0 : index
    %c0_14 = arith.constant 0 : index
    %26 = vector.load %arg4[%c0_13, %c0_14] : memref<1x128xf32, #tpu.memory_space<vmem>>, vector<1x128xf32>
    %27 = vector.broadcast %26 : vector<1x128xf32> to vector<8x128xf32>
    %28 = arith.addf %25, %27 : vector<8x128xf32>
    %29 = arith.truncf %28 : vector<8x128xf32> to vector<8x128xbf16>
    %c0_15 = arith.constant 0 : index
    %c0_16 = arith.constant 0 : index
    %30 = vector.load %arg5[%c0_15, %c0_16] : memref<128x128xbf16, #tpu.memory_space<vmem>>, vector<128x128xbf16>
    %cst_17 = arith.constant dense<0.000000e+00> : vector<8x128xf32>
    %31 = tpu.matmul %29, %30, %cst_17 {dimension_numbers = #tpu.dot_dimension_numbers<[1], [0], [0], [1], [0, 0, 1, 1], [], []>} : vector<8x128xbf16>, vector<128x128xbf16>, vector<8x128xf32> -> vector<8x128xf32>
    %c0_18 = arith.constant 0 : index
    %c0_19 = arith.constant 0 : index
    %32 = vector.load %arg6[%c0_18, %c0_19] : memref<1x128xf32, #tpu.memory_space<vmem>>, vector<1x128xf32>
    %33 = vector.broadcast %32 : vector<1x128xf32> to vector<8x128xf32>
    %34 = arith.addf %31, %33 : vector<8x128xf32>
    %cst_20 = arith.constant 0.000000e+00 : f32
    %35 = vector.broadcast %cst_20 : f32 to vector<8x128xf32>
    %36 = arith.maximumf %34, %35 : vector<8x128xf32>
    %cst_21 = arith.constant dense<0.000000e+00> : vector<128xf32>
    %37 = vector.multi_reduction <add>, %36, %cst_21 [0] : vector<8x128xf32> to vector<128xf32>
    %38 = vector.shape_cast %37 : vector<128xf32> to vector<1x128xf32>
    %cst_22 = arith.constant 1.250000e-01 : f32
    %39 = vector.broadcast %cst_22 : f32 to vector<1x128xf32>
    %40 = arith.mulf %38, %39 : vector<1x128xf32>
    %41 = vector.broadcast %40 : vector<1x128xf32> to vector<8x128xf32>
    %42 = arith.subf %36, %41 : vector<8x128xf32>
    %43 = arith.mulf %42, %42 : vector<8x128xf32>
    %cst_23 = arith.constant dense<0.000000e+00> : vector<128xf32>
    %44 = vector.multi_reduction <add>, %43, %cst_23 [0] : vector<8x128xf32> to vector<128xf32>
    %45 = vector.shape_cast %44 : vector<128xf32> to vector<1x128xf32>
    %cst_24 = arith.constant 1.250000e-01 : f32
    %46 = vector.broadcast %cst_24 : f32 to vector<1x128xf32>
    %47 = arith.mulf %45, %46 : vector<1x128xf32>
    %cst_25 = arith.constant 9.99999974E-6 : f32
    %48 = vector.broadcast %cst_25 : f32 to vector<1x128xf32>
    %49 = arith.addf %47, %48 : vector<1x128xf32>
    %50 = math.rsqrt %49 : vector<1x128xf32>
    %c0_26 = arith.constant 0 : index
    %c0_27 = arith.constant 0 : index
    %51 = vector.load %arg7[%c0_26, %c0_27] : memref<1x128xf32, #tpu.memory_space<vmem>>, vector<1x128xf32>
    %52 = arith.mulf %50, %51 : vector<1x128xf32>
    %53 = vector.broadcast %52 : vector<1x128xf32> to vector<8x128xf32>
    %54 = arith.mulf %42, %53 : vector<8x128xf32>
    %c0_28 = arith.constant 0 : index
    %c0_29 = arith.constant 0 : index
    %55 = vector.load %arg8[%c0_28, %c0_29] : memref<1x128xf32, #tpu.memory_space<vmem>>, vector<1x128xf32>
    %56 = vector.broadcast %55 : vector<1x128xf32> to vector<8x128xf32>
    %57 = arith.addf %54, %56 : vector<8x128xf32>
    %58 = arith.truncf %57 : vector<8x128xf32> to vector<8x128xbf16>
    %c0_30 = arith.constant 0 : index
    %c0_31 = arith.constant 0 : index
    %59 = vector.load %arg9[%c0_30, %c0_31] : memref<128x128xbf16, #tpu.memory_space<vmem>>, vector<128x128xbf16>
    %cst_32 = arith.constant dense<0.000000e+00> : vector<8x128xf32>
    %60 = tpu.matmul %58, %59, %cst_32 {dimension_numbers = #tpu.dot_dimension_numbers<[1], [0], [0], [1], [0, 0, 1, 1], [], []>} : vector<8x128xbf16>, vector<128x128xbf16>, vector<8x128xf32> -> vector<8x128xf32>
    %c0_33 = arith.constant 0 : index
    %c0_34 = arith.constant 0 : index
    %61 = vector.load %arg10[%c0_33, %c0_34] : memref<1x128xf32, #tpu.memory_space<vmem>>, vector<1x128xf32>
    %62 = vector.broadcast %61 : vector<1x128xf32> to vector<8x128xf32>
    %63 = arith.addf %60, %62 : vector<8x128xf32>
    %c0_35 = arith.constant 0 : index
    %c0_36 = arith.constant 0 : index
    %64 = vector.load %arg11[%c0_35, %c0_36] : memref<8x128xf32, #tpu.memory_space<vmem>>, vector<8x128xf32>
    tpu.vector_store %arg11[%c0_35, %c0_36], %63 {strides = array<i32>} : memref<8x128xf32, #tpu.memory_space<vmem>>, vector<8x128xf32>,
    return
  }
}

</mosaic_0001>

<bundles_post_ra>
// kernel: mlp_forward.1
= control target key start
LH: loop header
LB: loop body
LE: loop exit
PB: predicated region body
PF: predicated region fallthrough
CT: control target
= control target key end

     0   :  { %16 = vsyncpa [#allocation3], 0  ;;  %s877_s0 = inlined_call_operand.vmem [shape: bf16[8,128], index: 0, kind: input, shape index: {}]   ;;  %s878_s1 = inlined_call_operand.hbm [shape: bf16[128,128], index: 1, kind: input, shape index: {}]   ;;  %s879_s2 = inlined_call_operand.vmem [shape: f32[1,128], index: 2, kind: input, shape index: {}]   ;;  %s880_s3 = inlined_call_operand.vmem [shape: f32[1,128], index: 3, kind: input, shape index: {}]   ;;  %s881_s4 = inlined_call_operand.vmem [shape: f32[1,128], index: 4, kind: input, shape index: {}]   ;;  %s882_s5 = inlined_call_operand.hbm [shape: bf16[128,128], index: 5, kind: input, shape index: {}]   ;;  %s883_s6 = inlined_call_operand.vmem [shape: f32[1,128], index: 6, kind: input, shape index: {}]   ;;  %s884_s7 = inlined_call_operand.vmem [shape: f32[1,128], index: 7, kind: input, shape index: {}]   ;;  %s885_s8 = inlined_call_operand.vmem [shape: f32[1,128], index: 8, kind: input, shape index: {}]   ;;  %s886_s9 = inlined_call_operand.hbm [shape: bf16[128,128], index: 9, kind: input, shape index: {}]   ;;  %s887_s10 = inlined_call_operand.vmem [shape: f32[1,128], index: 10, kind: input, shape index: {}]   ;;  %s888_s11 = inlined_call_operand.hbm [shape: f32[8,128], index: 11, kind: output, shape index: {}]  }
   0x1   :  { %17 = vsyncpa [#allocation6], 0 }
   0x2   :  { %18 = vsyncpa [#allocation4], 0  ;;  %s740_s17 = smov [#allocation5]   ;;  %s741_s19 = smov [#allocation2]  }
   0x3   :  { %s44_s18 = sshll.u32 %s740_s17, 4  ;;  %s26_s20 = sshll.u32 %s741_s19, 4  ;;  %s45_s18 = int_to_ptr.vmem [resolvable:$true] %s44_s18  ;;  %s27_s20 = int_to_ptr.vmem [resolvable:$true] %s26_s20 }
   0x4   :  { %s662_s21 = scalar_lea.vmem %s45_s18, 1024  ;;  %p667_p1 = scmp.lt.s32.totalorder %s45_s18, %s45_s18 }
   0x5   :  { %p663_p0 = scmp.ne.s32.totalorder %s45_s18, %s662_s21  ;;  %p668_p2 = scmp.lt.s32.totalorder %s662_s21, %s662_s21 }
   0x7   :  { %p669_p3 = por %p668_p2, %p667_p1 }
   0x9   :  { %p670_p4 = pnand %p669_p3, %p663_p0 }
   0xb   :  { %673 = shalt.err (!%p670_p4)
}
   0xc   :  { %s742_s22 = smov 64   ;;  %s743_s23 = smov 4  }
   0xd   :  { %50 = dma.hbm_to_vmem [thread:$0]  %s882_s5, 1024, %s45_s18, [#allocation6], %s742_s22, %s742_s22, %s743_s23  }
   0xe   :  { %s682_s26 = scalar_lea.vmem %s27_s20, 1024  ;;  %p687_p6 = scmp.lt.s32.totalorder %s27_s20, %s27_s20 }
   0xf   :  { %p683_p5 = scmp.ne.s32.totalorder %s27_s20, %s682_s26  ;;  %p688_p7 = scmp.lt.s32.totalorder %s682_s26, %s682_s26 }
  0x11   :  { %p689_p8 = por %p688_p7, %p687_p6 }
  0x13   :  { %p690_p9 = pnand %p689_p8, %p683_p5 }
  0x15   :  { %693 = shalt.err (!%p690_p9)
}
  0x16   :  { %32 = dma.hbm_to_vmem [thread:$0]  %s878_s1, 1024, %s27_s20, [#allocation3], %s742_s22, %s742_s22, %s743_s23  }
  0x17   :  { %s744_s29 = smov [#allocation7]  }
  0x18   :  { %s62_s30 = sshll.u32 %s744_s29, 4  ;;  %s63_s30 = int_to_ptr.vmem [resolvable:$true] %s62_s30 }
  0x19   :  { %s702_s12 = scalar_lea.vmem %s63_s30, 1024  ;;  %p707_p11 = scmp.lt.s32.totalorder %s63_s30, %s63_s30 }
  0x1a   :  { %p703_p10 = scmp.ne.s32.totalorder %s63_s30, %s702_s12  ;;  %p708_p12 = scmp.lt.s32.totalorder %s702_s12, %s702_s12 }
  0x1c   :  { %p709_p13 = por %p708_p12, %p707_p11 }
  0x1e   :  { %p710_p0 = pnand %p709_p13, %p703_p10 }
  0x20   :  { %713 = shalt.err (!%p710_p0)
}
  0x21   :  { %68 = dma.hbm_to_vmem [thread:$0]  %s886_s9, 1024, %s63_s30, [#allocation6], %s742_s22, %s742_s22, %s743_s23  }
  0x22   :  { %734 = dma.done.wait [#allocation3], 1024  }
  0x23   :  { %735 = vsyncadd [#allocation3], 4294966272 }
  0x24   :  { %736 = dma.done.wait [#allocation6], 2048  }
  0x25   :  { %737 = vsyncadd [#allocation6], 4294965248  ;;  %v745_v0 = vmov 0.0   ;;  %vm746_vm0 = vmmov 0   ;;  %v626_v1 = vld [vmem:[#allocation2 + $0x38] sm:$0xff]   ;;  %v627_v2 = vld [vmem:[#allocation2 + $0x30] sm:$0xff]   ;;  %v214_v42 = vlaneseq }
  0x26   :  { %558 = vmatprep.subr.bf16.mxu0 %v745_v0  ;;  %574 = vmatprep.mubr.msk.bf16.mxu0 %vm746_vm0, %v745_v0  ;;  %v628_v3 = vld [vmem:[#allocation2 + $0x28] sm:$0xff]   ;;  %v629_v4 = vld [vmem:[#allocation2 + $0x20] sm:$0xff]   ;;  %v630_v5 = vld [vmem:[#allocation2 + $0x18] sm:$0xff]   ;;  %s747_s23 = smov [#allocation8]  }
  0x27   :  { %578 = vmatprep.subr.bf16.mxu1 %v745_v0  ;;  %594 = vmatprep.mubr.msk.bf16.mxu1 %vm746_vm0, %v745_v0  ;;  %v631_v6 = vld [vmem:[#allocation2 + $0x10] sm:$0xff]   ;;  %v632_v7 = vld [vmem:[#allocation2 + $0x8] sm:$0xff]   ;;  %v633_v8 = vld [vmem:[#allocation2] sm:$0xff]   ;;  %v846_v43 = vshrl.u32 %v214_v42, 7  ;;  %s492_s24 = sshll.u32 %s747_s23, 4  ;;  %s493_s24 = int_to_ptr.vmem [resolvable:$true] %s492_s24 }
  0x28   :  { %559 = vmatpush3.bf16.msra.mxu0 %v626_v1  ;;  %v81_v9 = vld [vmem:[%s877_s0] sm:$0xf]  ;;  %v634_v10 = vld [vmem:[#allocation5 + $0x38] sm:$0xff]   ;;  %v635_v11 = vld [vmem:[#allocation5 + $0x30] sm:$0xff]   ;;  %p719_p2 = scmp.lt.s32.totalorder %s493_s24, %s493_s24 }
  0x29   :  { %560 = vmatprep.subr.bf16.mxu0 %v745_v0  ;;  %579 = vmatpush3.bf16.msra.mxu1 %v634_v10  ;;  %v636_v12 = vld [vmem:[#allocation5 + $0x28] sm:$0xff]   ;;  %v637_v13 = vld [vmem:[#allocation5 + $0x20] sm:$0xff]   ;;  %v638_v14 = vld [vmem:[#allocation5 + $0x18] sm:$0xff]   ;;  %v216_v45 = vsub.s32 0, %v846_v43 }
  0x2a   :  { %580 = vmatprep.subr.bf16.mxu1 %v745_v0  ;;  %v639_v15 = vld [vmem:[#allocation5 + $0x10] sm:$0xff]   ;;  %v640_v16 = vld [vmem:[#allocation5 + $0x8] sm:$0xff]   ;;  %v641_v17 = vld [vmem:[#allocation5] sm:$0xff]  }
  0x2b   :  { %v502_v18 = vld [vmem:[%s879_s2] ss:$0 sm:$0xff]  ;;  %v642_v53 = vld [vmem:[#allocation7 + $0x38] sm:$0xff]   ;;  %v643_v54 = vld [vmem:[#allocation7 + $0x30] sm:$0xff]  }
  0x2c   :  { %561 = vmatpush3.bf16.msra.mxu0 %v627_v2  ;;  %v212_v44 = vld [vmem:[%s880_s3] sm:$0x1]  ;;  %v644_v55 = vld [vmem:[#allocation7 + $0x28] sm:$0xff]   ;;  %v646_v57 = vld [vmem:[#allocation7 + $0x18] sm:$0xff]  }
  0x2d   :  { %562 = vmatprep.subr.bf16.mxu0 %v745_v0  ;;  %581 = vmatpush3.bf16.msra.mxu1 %v635_v11  ;;  %v511_v49 = vld [vmem:[%s881_s4] ss:$0 sm:$0xff]  ;;  %v647_v58 = vld [vmem:[#allocation7 + $0x10] sm:$0xff]   ;;  %v648_v59 = vld [vmem:[#allocation7 + $0x8] sm:$0xff]  }
  0x2e   :  { %582 = vmatprep.subr.bf16.mxu1 %v745_v0  ;;  %v645_v56 = vld [vmem:[#allocation7 + $0x20] sm:$0xff]  }
  0x2f   :  { %v649_v60 = vld [vmem:[#allocation7] sm:$0xff]  }
  0x30   :  { %563 = vmatpush3.bf16.msra.mxu0 %v628_v3  ;;  %v512_v61 = vld [vmem:[%s883_s6] ss:$0 sm:$0xff] }
  0x31   :  { %564 = vmatprep.subr.bf16.mxu0 %v745_v0  ;;  %583 = vmatpush3.bf16.msra.mxu1 %v636_v12 }
  0x32   :  { %584 = vmatprep.subr.bf16.mxu1 %v745_v0 }
  0x34   :  { %565 = vmatpush3.bf16.msra.mxu0 %v629_v4 }
  0x35   :  { %566 = vmatprep.subr.bf16.mxu0 %v745_v0  ;;  %585 = vmatpush3.bf16.msra.mxu1 %v637_v13 }
  0x36   :  { %586 = vmatprep.subr.bf16.mxu1 %v745_v0 }
  0x38   :  { %567 = vmatpush3.bf16.msra.mxu0 %v630_v5 }
  0x39   :  { %568 = vmatprep.subr.bf16.mxu0 %v745_v0  ;;  %587 = vmatpush3.bf16.msra.mxu1 %v638_v14 }
  0x3a   :  { %588 = vmatprep.subr.bf16.mxu1 %v745_v0 }
  0x3c   :  { %569 = vmatpush3.bf16.msra.mxu0 %v631_v6 }
  0x3d   :  { %570 = vmatprep.subr.bf16.mxu0 %v745_v0  ;;  %589 = vmatpush3.bf16.msra.mxu1 %v639_v15 }
  0x3e   :  { %590 = vmatprep.subr.bf16.mxu1 %v745_v0 }
  0x40   :  { %571 = vmatpush3.bf16.msra.mxu0 %v632_v7 }
  0x41   :  { %572 = vmatprep.subr.bf16.mxu0 %v745_v0  ;;  %591 = vmatpush3.bf16.msra.mxu1 %v640_v16 }
  0x42   :  { %592 = vmatprep.subr.bf16.mxu1 %v745_v0 }
  0x44   :  { %573 = vmatpush3.bf16.msra.mxu0 %v633_v8 }
  0x45   :  { %598 = vmatprep.subr.bf16.mxu0 %v745_v0  ;;  %593 = vmatpush3.bf16.msra.mxu1 %v641_v17 }
  0x47   :  { %575 = vmatmul.mubr.bf16.vlgmr.msra.gmra.mxu0 %v81_v9 }
  0x48   :  { %614 = vmatprep.mubr.msk.bf16.mxu0 %vm746_vm0, %v745_v0  ;;  %599 = vmatpush3.bf16.msra.mxu0 %v642_v53 }
  0x49   :  { %600 = vmatprep.subr.bf16.mxu0 %v745_v0 }
  0x4c   :  { %601 = vmatpush3.bf16.msra.mxu0 %v643_v54 }
  0x4d   :  { %602 = vmatprep.subr.bf16.mxu0 %v745_v0 }
  0x50   :  { %603 = vmatpush3.bf16.msra.mxu0 %v644_v55 }
  0x51   :  { %604 = vmatprep.subr.bf16.mxu0 %v745_v0 }
  0x54   :  { %605 = vmatpush3.bf16.msra.mxu0 %v645_v56 }
  0x55   :  { %606 = vmatprep.subr.bf16.mxu0 %v745_v0 }
  0x58   :  { %607 = vmatpush3.bf16.msra.mxu0 %v646_v57 }
  0x59   :  { %608 = vmatprep.subr.bf16.mxu0 %v745_v0 }
  0x5c   :  { %609 = vmatpush3.bf16.msra.mxu0 %v647_v58 }
  0x5d   :  { %610 = vmatprep.subr.bf16.mxu0 %v745_v0 }
  0x60   :  { %611 = vmatpush3.bf16.msra.mxu0 %v648_v59 }
  0x61   :  { %612 = vmatprep.subr.bf16.mxu0 %v745_v0 }
  0x64   :  { %613 = vmatpush3.bf16.msra.mxu0 %v649_v60 }
 0x107   :  { %v187_v19 = vpop.f32.mrf.mxu0 }
 0x108   :  { %v188_v20 = vadd.f32 %v502_v18, %v187_v19 }
 0x109   :  { %v576_v21 = vpop.f32.mrf.mxu0 }
 0x10a   :  { %v193_v22 = vmax.f32 %v188_v20, 0.0  ;;  %v358_v21 = vld [vmem:[%s884_s7] sm:$0x1]  ;;  %s714_s7 = scalar_lea.vmem %s493_s24, 128 }
 0x10b   :  { %v190_v23 = vpop.f32.mrf.mxu0  ;;  %p715_p1 = scmp.ne.s32.totalorder %s493_s24, %s714_s7  ;;  %p720_p3 = scmp.lt.s32.totalorder %s714_s7, %s714_s7 }
 0x10c   :  { %v194_v24 = vrot.slane %v193_v22, 4 }
 0x10d   :  { %v577_v25 = vpop.f32.mrf.mxu0  ;;  %p721_p4 = por %p720_p3, %p719_p2 }
 0x10e   :  { %v195_v26 = vadd.f32 %v194_v24, %v193_v22  ;;  %v521_v25 = vld [vmem:[%s885_s8] ss:$0 sm:$0xff] }
 0x10f   :  { %p722_p5 = pnand %p721_p4, %p715_p1 }
 0x110   :  { %v196_v27 = vrot.slane %v195_v26, 2 }
 0x112   :  { %v197_v28 = vadd.f32 %v196_v27, %v195_v26 }
 0x114   :  { %v198_v29 = vrot.slane %v197_v28, 1 }
 0x116   :  { %v199_v30 = vadd.f32 %v198_v29, %v197_v28  ;;  %v522_v29 = vld [vmem:[%s887_s10] ss:$0 sm:$0xff] }
 0x118   :  { %v200_v31 = vmul.f32 0.125, %v199_v30 }
 0x11a   :  { %v201_v32 = vsub.f32 %v193_v22, %v200_v31 }
 0x11c   :  { %v202_v33 = vmul.f32 %v201_v32, %v201_v32 }
 0x11e   :  { %v203_v34 = vrot.slane %v202_v33, 4 }
 0x120   :  { %v204_v35 = vadd.f32 %v203_v34, %v202_v33 }
 0x122   :  { %v205_v36 = vrot.slane %v204_v35, 2 }
 0x124   :  { %v206_v37 = vadd.f32 %v205_v36, %v204_v35 }
 0x126   :  { %v207_v38 = vrot.slane %v206_v37, 1 }
 0x128   :  { %v208_v39 = vadd.f32 %v207_v38, %v206_v37 }
 0x12a   :  { %v209_v40 = vmul.f32 0.125, %v208_v39 }
 0x12c   :  { %v210_v41 = vadd.f32 1e-05, %v209_v40 }
 0x12e   :  { %650 = vrsqrt.f32 %v210_v41 }
 0x13b   :  { %v651_v46 = vpop.eup %650 }
 0x13c   :  { %v213_v47 = vmul.f32 %v651_v46, %v212_v44 }
 0x13e   :  { %v217_v48 = vrot.slane %v213_v47, %v216_v45 }
 0x140   :  { %v218_v50 = vmul.f32 %v217_v48, %v201_v32 }
 0x142   :  { %v226_v51 = vadd.f32 %v511_v49, %v218_v50 }
 0x144   :  { %v227_v52 = vpack.c.bf16 %v226_v51, %v226_v51 }
 0x146   :  { %595 = vmatmul.mubr.bf16.vlgmr.msra.gmra.mxu1 %v227_v52 }
 0x206   :  { %v333_v62 = vpop.f32.mrf.mxu1 }
 0x207   :  { %v334_v63 = vadd.f32 %v512_v61, %v333_v62 }
 0x208   :  { %v596_v1 = vpop.f32.mrf.mxu1 }
 0x209   :  { %v339_v2 = vmax.f32 %v334_v63, 0.0 }
 0x20a   :  { %v336_v3 = vpop.f32.mrf.mxu1 }
 0x20b   :  { %v340_v4 = vrot.slane %v339_v2, 4 }
 0x20c   :  { %v597_v5 = vpop.f32.mrf.mxu1 }
 0x20d   :  { %v341_v6 = vadd.f32 %v340_v4, %v339_v2 }
 0x20f   :  { %v342_v7 = vrot.slane %v341_v6, 2 }
 0x211   :  { %v343_v8 = vadd.f32 %v342_v7, %v341_v6 }
 0x213   :  { %v344_v9 = vrot.slane %v343_v8, 1 }
 0x215   :  { %v345_v10 = vadd.f32 %v344_v9, %v343_v8 }
 0x217   :  { %v346_v11 = vmul.f32 0.125, %v345_v10 }
 0x219   :  { %v347_v0 = vsub.f32 %v339_v2, %v346_v11 }
 0x21b   :  { %v348_v12 = vmul.f32 %v347_v0, %v347_v0 }
 0x21d   :  { %v349_v13 = vrot.slane %v348_v12, 4 }
 0x21f   :  { %v350_v14 = vadd.f32 %v349_v13, %v348_v12 }
 0x221   :  { %v351_v15 = vrot.slane %v350_v14, 2 }
 0x223   :  { %v352_v16 = vadd.f32 %v351_v15, %v350_v14 }
 0x225   :  { %v353_v17 = vrot.slane %v352_v16, 1 }
 0x227   :  { %v354_v18 = vadd.f32 %v353_v17, %v352_v16 }
 0x229   :  { %v355_v19 = vmul.f32 0.125, %v354_v18 }
 0x22b   :  { %v356_v20 = vadd.f32 1e-05, %v355_v19 }
 0x22d   :  { %652 = vrsqrt.f32 %v356_v20 }
 0x23a   :  { %v653_v22 = vpop.eup %652 }
 0x23b   :  { %v359_v23 = vmul.f32 %v653_v22, %v358_v21 }
 0x23d   :  { %v363_v24 = vrot.slane %v359_v23, %v216_v45 }
 0x23f   :  { %v364_v26 = vmul.f32 %v363_v24, %v347_v0 }
 0x241   :  { %v372_v27 = vadd.f32 %v521_v25, %v364_v26 }
 0x243   :  { %v373_v28 = vpack.c.bf16 %v372_v27, %v372_v27 }
 0x245   :  { %615 = vmatmul.mubr.bf16.vlgmr.msra.gmra.mxu0 %v373_v28 }
 0x305   :  { %v479_v30 = vpop.f32.mrf.mxu0 }
 0x306   :  { %v480_v31 = vadd.f32 %v522_v29, %v479_v30 }
 0x307   :  { %v616_v32 = vpop.f32.mrf.mxu0 }
 0x308   :  { %485 = vst [vmem:[#allocation8] sm:$0xff] %v480_v31 }
 0x309   :  { %v482_v33 = vpop.f32.mrf.mxu0 }
 0x30a   :  { %725 = shalt.err (!%p722_p5)
}
 0x30b   :  { %495 = dma.vmem_to_hbm [thread:$0]  %s493_s24, 128, %s888_s11, [#allocation4]   ;;  %v617_v34 = vpop.f32.mrf.mxu0 }
 0x30c   :  { %738 = dma.done.wait [#allocation4], 128  }
 0x30d   :  { %739 = vsyncadd [#allocation4], 4294967168 }
 0x30e   :  { %499 = vsyncpa [#allocation3], 1 }
 0x30f   :  { %500 = vsyncpa [#allocation6], 1 }
 0x310   :  { %501 = vsyncpa [#allocation4], 1 }

</bundles_post_ra>
